<compile_context>
chip_gen: v7x
topology: tpu7x:2x2x1
jax: 0.10.0
libtpu: 0.0.40
codegen_flags: <defaults>
</compile_context>

<pallas_src>
import functools
import math

import numpy as np
import jax
import jax.numpy as jnp
from jax import lax
from jax.experimental import pallas as pl
from jax.experimental.pallas import tpu as pltpu


# Contract the last dim of both operands: (B,K) . (N,K) -> (B,N), no transpose.
_NT_DIMS = (((1,), (1,)), ((), ()))

# Tile budget used to derive the class-tile size (double-buffered weight +
# double-buffered output + resident x), conservative for v7x VMEM.
_VMEM_TILE_BUDGET = 24 * 1024 * 1024
# Scoped VMEM limit requested from the compiler (raises v5e's 16 MiB default,
# stays below v7x's 32 MiB scoped default / 64 MiB physical).
_VMEM_LIMIT_BYTES = 28 * 1024 * 1024


def _arcmargin_kernel(x_ref, label_ref, w_ref, *rest, s, cos_m, sin_m, th, mm,
                      sub, tn, easy_margin, has_winv):
    if has_winv:
        winv_ref, out_ref = rest
    else:
        (out_ref,) = rest

    eps = 1e-12  # matches F.normalize default eps

    x32 = x_ref[...].astype(jnp.float32)                     # (B, K) f32
    b, k = x32.shape

    # 1 / max(||x||, eps) per row == rsqrt(max(sum(x^2), eps^2)).  Recomputed
    # every grid step on purpose (see header): a program_id(0)==0 scratch init
    # is unsafe under megacore-parallel sharding of the class axis, and this
    # one-vreg reduce + EUP rsqrt hides under the weight DMA anyway.
    x_inv = lax.rsqrt(jnp.maximum(jnp.sum(x32 * x32, axis=-1, keepdims=True),
                                  eps * eps))                 # (B, 1) f32

    # MXU operands in the streamed weight dtype (bf16 by default), f32 accum.
    x_mm = x32.astype(w_ref.dtype)
    ones_row = None if has_winv else jnp.ones((1, k), dtype=w_ref.dtype)

    cosine = None
    for si in range(sub):
        w_s = w_ref[si]                                       # (TN, K) streamed dtype

        if has_winv:
            w_inv = winv_ref[si]                              # (1, TN) f32
        else:
            # Per-weight-row sum of squares produced directly in lane-major
            # (1, TN) layout via an MXU contraction (no XLU relayout).
            w_sumsq = lax.dot_general(ones_row, w_s * w_s, _NT_DIMS,
                                      preferred_element_type=jnp.float32)
            w_inv = lax.rsqrt(jnp.maximum(w_sumsq, eps * eps))

        # Raw inner products; normalization folded into output scaling.
        raw = lax.dot_general(x_mm, w_s, _NT_DIMS,
                              preferred_element_type=jnp.float32)  # (B, TN) f32
        cos_s = raw * x_inv * w_inv
        cosine = cos_s if cosine is None else jnp.maximum(cosine, cos_s)

    # Arc-margin math in f32.  Clip only guards against |cos| > 1 rounding.
    sine = jnp.sqrt(jnp.clip(1.0 - cosine * cosine, 0.0, 1.0))
    phi = cosine * cos_m - sine * sin_m
    if easy_margin:
        phi = jnp.where(cosine > 0, phi, cosine)
    else:
        phi = jnp.where(cosine - th > 0, phi, cosine - mm)

    # One-hot blend as a single select; account for this block's class offset.
    labels = label_ref[...].astype(jnp.int32)                 # (B, 1)
    col0 = pl.program_id(0) * tn
    class_ids = col0 + lax.broadcasted_iota(jnp.int32, (b, tn), 1)
    out = jnp.where(class_ids == labels, phi, cosine) * s
    out_ref[...] = out.astype(out_ref.dtype)


def arc_margin_product(x, weight, label, *, out_features, s=32.0, m=0.5,
                       sub=1, easy_margin=False, block_n=None,
                       weight_dtype=jnp.bfloat16, precompute_w_inv=False):
    """Pallas implementation of ArcMarginProduct.forward(x, label)."""
    B, in_features = x.shape
    assert weight.shape == (out_features * sub, in_features)

    cos_m = math.cos(m)
    sin_m = math.sin(m)
    th = math.cos(math.pi - m)
    mm = math.sin(math.pi - m) * m
    eps = 1e-12

    # PyTorch weight rows are ordered (class-major, sub-minor).  Re-lay out to
    # (sub, out_features, in_features) so the max over `sub` is a running
    # maximum over lane-dense matmul tiles inside the kernel.
    w3 = weight.astype(jnp.float32).reshape(out_features, sub, in_features)
    w3 = w3.transpose(1, 0, 2)

    # ---- class-axis tiling: VMEM-budgeted, v7x-friendly, low padding ----
    w_itemsize = np.dtype(weight_dtype).itemsize
    n_lanes = -(-out_features // 128)                         # 128-lane groups
    fixed_bytes = B * in_features * 4 + 128 * 4               # resident x + labels
    per_lane_bytes = 128 * (2 * sub * in_features * w_itemsize   # 2x weight tile
                            + 2 * B * 4                          # 2x f32 out tile
                            + (2 * sub * 4 if precompute_w_inv else 0))
    cap_lanes = max(1, (_VMEM_TILE_BUDGET - fixed_bytes) // per_lane_bytes)
    if block_n is not None:
        cap_lanes = max(1, min(cap_lanes, block_n // 128))

    nb = -(-n_lanes // cap_lanes)
    if n_lanes >= 2:
        nb = max(nb, 2)                       # feed both v7x TensorCores
        if nb % 2 == 1 and nb < n_lanes:
            nb += 1                           # prefer an even tile count
    tn_lanes = -(-n_lanes // nb)              # balanced tile -> minimal padding
    tn = tn_lanes * 128
    n_blocks = -(-n_lanes // tn_lanes)
    n_pad = n_blocks * tn

    if n_pad != out_features:
        # Zero padding is required: padded rows give raw==0 so padded output
        # columns stay exactly 0 (and are sliced off below).
        w3 = jnp.pad(w3, ((0, 0), (0, n_pad - out_features), (0, 0)))

    label2d = label.reshape(B, 1).astype(jnp.int32)

    inputs = [x.astype(jnp.float32), label2d, w3.astype(weight_dtype)]
    in_specs = [
        pl.BlockSpec((B, in_features), lambda j: (0, 0)),           # x (resident)
        pl.BlockSpec((B, 1), lambda j: (0, 0)),                     # labels (resident)
        # Weight tiles streamed/double-buffered by BlockSpec.  A cheap sweep if
        # traces show exposed DMA: pipeline_mode=pl.Buffered(3).
        pl.BlockSpec((sub, tn, in_features), lambda j: (0, j, 0)),
    ]
    if precompute_w_inv:
        # f32 per-row rsqrt(||w||^2), computed from the f32 (padded) weights so
        # normalization stays full precision even with bf16 streaming.
        w_inv = lax.rsqrt(jnp.maximum(jnp.sum(w3 * w3, axis=-1), eps * eps))
        inputs.append(w_inv.reshape(sub, 1, n_pad))
        in_specs.append(pl.BlockSpec((sub, 1, tn), lambda j: (0, 0, j)))

    kernel = functools.partial(
        _arcmargin_kernel,
        s=float(s), cos_m=cos_m, sin_m=sin_m, th=th, mm=mm,
        sub=sub, tn=tn, easy_margin=easy_margin, has_winv=precompute_w_inv)

    flops = 2 * B * in_features * n_pad * sub
    if not precompute_w_inv:
        flops += 2 * in_features * n_pad * sub
    bytes_accessed = (x.size * 4 + B * 4
                      + sub * n_pad * in_features * w_itemsize
                      + (sub * n_pad * 4 if precompute_w_inv else 0)
                      + B * n_pad * 4)
    cost = pl.CostEstimate(
        flops=int(flops),
        transcendentals=int(B * n_blocks
                            + (0 if precompute_w_inv else n_pad * sub)
                            + B * n_pad),
        bytes_accessed=int(bytes_accessed))

    out = pl.pallas_call(
        kernel,
        out_shape=jax.ShapeDtypeStruct((B, n_pad), jnp.float32),
        grid_spec=pltpu.PrefetchScalarGridSpec(
            num_scalar_prefetch=0,
            grid=(n_blocks,),
            in_specs=in_specs,
            out_specs=pl.BlockSpec((B, tn), lambda j: (0, j)),
        ),
        compiler_params=pltpu.CompilerParams(
            dimension_semantics=("parallel",),
            vmem_limit_bytes=_VMEM_LIMIT_BYTES),
        cost_estimate=cost,
    )(*inputs)

    return out[:, :out_features]


def xavier_uniform(key, shape, dtype=jnp.float32):
    fan_out, fan_in = shape
    bound = math.sqrt(6.0 / (fan_in + fan_out))
    return jax.random.uniform(key, shape, dtype, minval=-bound, maxval=bound)


def _reference(x, weight, label, *, out_features, s, m, sub, easy_margin):
    """Pure-JAX replica of the PyTorch forward, for correctness checking."""
    eps = 1e-12
    xn = x / jnp.maximum(jnp.linalg.norm(x, axis=1, keepdims=True), eps)
    wn = weight / jnp.maximum(jnp.linalg.norm(weight, axis=1, keepdims=True), eps)
    cosine = xn @ wn.T
    if sub > 1:
        cosine = cosine.reshape(-1, out_features, sub).max(axis=2)
    sine = jnp.sqrt(jnp.clip(1.0 - cosine * cosine, 0.0, 1.0))
    cos_m, sin_m = math.cos(m), math.sin(m)
    th, mm = math.cos(math.pi - m), math.sin(math.pi - m) * m
    phi = cosine * cos_m - sine * sin_m
    if easy_margin:
        phi = jnp.where(cosine > 0, phi, cosine)
    else:
        phi = jnp.where(cosine - th > 0, phi, cosine - mm)
    one_hot = jax.nn.one_hot(label, out_features, dtype=cosine.dtype)
    return (one_hot * phi + (1.0 - one_hot) * cosine) * s


if __name__ == "__main__":
    # Module defaults: in_features=128, out_features=200, s=32.0, m=0.5, sub=1
    in_features = 128
    B = 8

    key = jax.random.PRNGKey(0)
    kx, kw, kl, kw2, kl2, kw3, kl3 = jax.random.split(key, 7)
    x = jax.random.normal(kx, (B, in_features), dtype=jnp.float32)

    # --- Test 1: module defaults (out=200, sub=1), exact f32 path, auto tiling
    out_features = 200
    weight = xavier_uniform(kw, (out_features, in_features))
    label = jax.random.randint(kl, (B,), 0, out_features, dtype=jnp.int32)
    out = arc_margin_product(x, weight, label, out_features=out_features,
                             s=32.0, m=0.5, sub=1, easy_margin=False,
                             weight_dtype=jnp.float32)
    jax.block_until_ready(out)
    assert out.shape == (B, out_features)
    ref = _reference(x, weight, label, out_features=out_features,
                     s=32.0, m=0.5, sub=1, easy_margin=False)
    assert jnp.allclose(out, ref, rtol=1e-3, atol=1e-3), "f32 sub=1 mismatch"

    # --- Test 2: sub=2 with precomputed/streamed w_inv, exact f32 path
    out_features2, sub2 = 128, 2
    weight2 = xavier_uniform(kw2, (out_features2 * sub2, in_features))
    label2 = jax.random.randint(kl2, (B,), 0, out_features2, dtype=jnp.int32)
    out2 = arc_margin_product(x, weight2, label2, out_features=out_features2,
                              s=32.0, m=0.5, sub=sub2, easy_margin=False,
                              weight_dtype=jnp.float32, precompute_w_inv=True)
    jax.block_until_ready(out2)
    assert out2.shape == (B, out_features2)
    ref2 = _reference(x, weight2, label2, out_features=out_features2,
                      s=32.0, m=0.5, sub=sub2, easy_margin=False)
    assert jnp.allclose(out2, ref2, rtol=1e-3, atol=1e-3), "f32 sub=2 mismatch"

    # --- Test 3: default bf16 weight streaming, larger class count (2 tiles)
    out_features3 = 1000
    weight3 = xavier_uniform(kw3, (out_features3, in_features))
    label3 = jax.random.randint(kl3, (B,), 0, out_features3, dtype=jnp.int32)
    out3 = arc_margin_product(x, weight3, label3, out_features=out_features3,
                              s=32.0, m=0.5, sub=1, easy_margin=False)
    jax.block_until_ready(out3)
    assert out3.shape == (B, out_features3)
    ref3 = _reference(x, weight3, label3, out_features=out_features3,
                      s=32.0, m=0.5, sub=1, easy_margin=False)
    # bf16 streaming shifts cosine by O(2^-9); loose absolute bound vs f32 ref.
    assert float(jnp.max(jnp.abs(out3 - ref3))) < 0.5, "bf16 smoke mismatch"

    # --- Test 4: easy_margin branch (f32).  Near the cos>0 threshold the
    # select can flip on tiny rounding differences, so use a mean-based check.
    out4 = arc_margin_product(x, weight, label, out_features=out_features,
                              s=32.0, m=0.5, sub=1, easy_margin=True,
                              weight_dtype=jnp.float32)
    jax.block_until_ready(out4)
    ref4 = _reference(x, weight, label, out_features=out_features,
                      s=32.0, m=0.5, sub=1, easy_margin=True)
    assert float(jnp.mean(jnp.abs(out4 - ref4))) < 0.02, "easy_margin mismatch"

    print("KERNEL_OK")
</pallas_src>

<mosaic_0001>
module attributes {stable_mosaic.version = 11 : i64} {
  func.func @_arcmargin_kernel(%arg0: i32, %arg1: memref<8x128xf32, #tpu.memory_space<vmem>>, %arg2: memref<8x1xi32, #tpu.memory_space<vmem>>, %arg3: memref<1x128x128xf32, #tpu.memory_space<vmem>>, %arg4: memref<8x128xf32, #tpu.memory_space<vmem>>) attributes {dimension_semantics = [#tpu.dimension_semantics<parallel>], iteration_bounds = array<i64: 2>, scalar_prefetch = 0 : i64, scratch_operands = 0 : i64, tpu.core_type = #tpu.core_type<tc>, window_params = [{pipeline_mode = #tpu.pipeline_mode<synchronous>, transform_indices = @transform_0, window_bounds = array<i64: 8, 128>}, {pipeline_mode = #tpu.pipeline_mode<synchronous>, transform_indices = @transform_1, window_bounds = array<i64: 8, 1>}, {transform_indices = @transform_2, window_bounds = array<i64: 1, 128, 128>}, {transform_indices = @transform_3, window_bounds = array<i64: 8, 128>}]} {
    %c0 = arith.constant 0 : index
    %c0_0 = arith.constant 0 : index
    %0 = vector.load %arg1[%c0, %c0_0] : memref<8x128xf32, #tpu.memory_space<vmem>>, vector<8x128xf32>
    %1 = arith.mulf %0, %0 : vector<8x128xf32>
    %cst = arith.constant dense<0.000000e+00> : vector<8xf32>
    %2 = vector.multi_reduction <add>, %1, %cst [1] : vector<8x128xf32> to vector<8xf32>
    %3 = vector.shape_cast %2 : vector<8xf32> to vector<8x1xf32>
    %cst_1 = arith.constant 1.000000e-24 : f32
    %4 = vector.broadcast %cst_1 : f32 to vector<8x1xf32>
    %5 = arith.maximumf %3, %4 : vector<8x1xf32>
    %6 = math.rsqrt %5 : vector<8x1xf32>
    %cst_2 = arith.constant 1.000000e+00 : f32
    %7 = vector.broadcast %cst_2 : f32 to vector<1x128xf32>
    %c0_3 = arith.constant 0 : index
    %c0_4 = arith.constant 0 : index
    %c0_5 = arith.constant 0 : index
    %8 = vector.load %arg3[%c0_3, %c0_4, %c0_5] : memref<1x128x128xf32, #tpu.memory_space<vmem>>, vector<1x128x128xf32>
    %9 = vector.shape_cast %8 : vector<1x128x128xf32> to vector<128x128xf32>
    %10 = arith.mulf %9, %9 : vector<128x128xf32>
    %cst_6 = arith.constant dense<0.000000e+00> : vector<1x128xf32>
    %11 = tpu.matmul %7, %10, %cst_6 {dimension_numbers = #tpu.dot_dimension_numbers<[1], [1], [0], [0], [0, 0, 1, 0], [], []>} : vector<1x128xf32>, vector<128x128xf32>, vector<1x128xf32> -> vector<1x128xf32>
    %cst_7 = arith.constant 1.000000e-24 : f32
    %12 = vector.broadcast %cst_7 : f32 to vector<1x128xf32>
    %13 = arith.maximumf %11, %12 : vector<1x128xf32>
    %14 = math.rsqrt %13 : vector<1x128xf32>
    %cst_8 = arith.constant dense<0.000000e+00> : vector<8x128xf32>
    %15 = tpu.matmul %0, %9, %cst_8 {dimension_numbers = #tpu.dot_dimension_numbers<[1], [1], [0], [0], [0, 0, 1, 0], [], []>} : vector<8x128xf32>, vector<128x128xf32>, vector<8x128xf32> -> vector<8x128xf32>
    %16 = vector.broadcast %6 : vector<8x1xf32> to vector<8x128xf32>
    %17 = arith.mulf %15, %16 : vector<8x128xf32>
    %18 = vector.broadcast %14 : vector<1x128xf32> to vector<8x128xf32>
    %19 = arith.mulf %17, %18 : vector<8x128xf32>
    %20 = arith.mulf %19, %19 : vector<8x128xf32>
    %cst_9 = arith.constant 1.000000e+00 : f32
    %21 = vector.broadcast %cst_9 : f32 to vector<8x128xf32>
    %22 = arith.subf %21, %20 : vector<8x128xf32>
    %cst_10 = arith.constant 0.000000e+00 : f32
    %cst_11 = arith.constant 1.000000e+00 : f32
    %23 = vector.broadcast %cst_10 : f32 to vector<8x128xf32>
    %24 = arith.maximumf %23, %22 : vector<8x128xf32>
    %25 = vector.broadcast %cst_11 : f32 to vector<8x128xf32>
    %26 = arith.minimumf %25, %24 : vector<8x128xf32>
    %27 = math.sqrt %26 : vector<8x128xf32>
    %cst_12 = arith.constant 0.87758255 : f32
    %28 = vector.broadcast %cst_12 : f32 to vector<8x128xf32>
    %29 = arith.mulf %19, %28 : vector<8x128xf32>
    %cst_13 = arith.constant 0.47942555 : f32
    %30 = vector.broadcast %cst_13 : f32 to vector<8x128xf32>
    %31 = arith.mulf %27, %30 : vector<8x128xf32>
    %32 = arith.subf %29, %31 : vector<8x128xf32>
    %cst_14 = arith.constant -0.87758255 : f32
    %33 = vector.broadcast %cst_14 : f32 to vector<8x128xf32>
    %34 = arith.subf %19, %33 : vector<8x128xf32>
    %cst_15 = arith.constant 0.000000e+00 : f32
    %35 = vector.broadcast %cst_15 : f32 to vector<8x128xf32>
    %36 = arith.cmpf ogt, %34, %35 : vector<8x128xf32>
    %cst_16 = arith.constant 0.239712775 : f32
    %37 = vector.broadcast %cst_16 : f32 to vector<8x128xf32>
    %38 = arith.subf %19, %37 : vector<8x128xf32>
    %39 = arith.select %36, %32, %38 : vector<8x128xi1>, vector<8x128xf32>
    %c0_17 = arith.constant 0 : index
    %c0_18 = arith.constant 0 : index
    %40 = vector.load %arg2[%c0_17, %c0_18] : memref<8x1xi32, #tpu.memory_space<vmem>>, vector<8x1xi32>
    %c128_i32 = arith.constant 128 : i32
    %41 = arith.muli %arg0, %c128_i32 : i32
    %42 = tpu.iota {dimensions = array<i32: 1>} : vector<8x128xi32>
    %43 = vector.broadcast %41 : i32 to vector<8x128xi32>
    %44 = arith.addi %43, %42 : vector<8x128xi32>
    %45 = vector.broadcast %40 : vector<8x1xi32> to vector<8x128xi32>
    %46 = arith.cmpi eq, %44, %45 : vector<8x128xi32>
    %47 = arith.select %46, %39, %19 : vector<8x128xi1>, vector<8x128xf32>
    %cst_19 = arith.constant 3.200000e+01 : f32
    %48 = vector.broadcast %cst_19 : f32 to vector<8x128xf32>
    %49 = arith.mulf %47, %48 : vector<8x128xf32>
    %c0_20 = arith.constant 0 : index
    %c0_21 = arith.constant 0 : index
    %50 = vector.load %arg4[%c0_20, %c0_21] : memref<8x128xf32, #tpu.memory_space<vmem>>, vector<8x128xf32>
    tpu.vector_store %arg4[%c0_20, %c0_21], %49 {strides = array<i32>} : memref<8x128xf32, #tpu.memory_space<vmem>>, vector<8x128xf32>,
    return
  }
  func.func @transform_0(%arg0: i32) -> (i32, i32) {
    %c0_i32 = arith.constant 0 : i32
    %c0_i32_0 = arith.constant 0 : i32
    %c0_i32_1 = arith.constant 0 : i32
    return %c0_i32, %c0_i32_0 : i32, i32
  }
  func.func @transform_1(%arg0: i32) -> (i32, i32) {
    %c0_i32 = arith.constant 0 : i32
    %c0_i32_0 = arith.constant 0 : i32
    %c0_i32_1 = arith.constant 0 : i32
    return %c0_i32, %c0_i32_0 : i32, i32
  }
  func.func @transform_2(%arg0: i32) -> (i32, i32, i32) {
    %c0_i32 = arith.constant 0 : i32
    %c0_i32_0 = arith.constant 0 : i32
    %c0_i32_1 = arith.constant 0 : i32
    return %c0_i32, %arg0, %c0_i32_0 : i32, i32, i32
  }
  func.func @transform_3(%arg0: i32) -> (i32, i32) {
    %c0_i32 = arith.constant 0 : i32
    %c0_i32_0 = arith.constant 0 : i32
    return %c0_i32, %arg0 : i32, i32
  }
}

</mosaic_0001>

<bundles_post_ra>
// kernel: tpu_custom_call.1
= control target key start
LH: loop header
LB: loop body
LE: loop exit
PB: predicated region body
PF: predicated region fallthrough
CT: control target
= control target key end

     0   :  { %8 = vsyncpa [#allocation3], 0  ;;  %s1053_s0 = inlined_call_operand.vmem [shape: f32[8,128], index: 0, kind: input, shape index: {}]   ;;  %s1054_s1 = inlined_call_operand.vmem [shape: s32[8,1], index: 1, kind: input, shape index: {}]   ;;  %s1055_s2 = inlined_call_operand.hbm [shape: f32[1,256,128], index: 2, kind: input, shape index: {}]   ;;  %s1056_s3 = inlined_call_operand.hbm [shape: f32[8,256], index: 3, kind: output, shape index: {}]  }
   0x1   :  { %10 = vsyncpa [#allocation3 + $0x1], 0 }
   0x2   :  { %11 = vsyncpa [#allocation4], 0 }
   0x3   :  { %13 = vsyncpa [#allocation4 + $0x1], 0  ;;  %s847_s12 = smov 0   ;;  %s849_s13 = smov 0  }
   0x4   :  { %s851_s14 = smov 0   ;;  %s853_s15 = smov 0  }
   0x5 LB: > { %s868_s16 = sadd.s32 4294967295, %s816_s15   ;;  %s491_s17 = sadd.s32 4294967294, %s816_s15   ;;  %s816_s15 = sphi %s853_s15, %s1069_s15   ;;  %s812_s14 = sphi %s851_s14, %s1068_s14   ;;  %s808_s13 = sphi %s849_s13, %s1067_s13   ;;  %s804_s12 = sphi %s847_s12, %s1066_s12  }
   0x6   : > { %s872_s18 = sadd.s32 1, %s816_s15   ;;  %s68_s19 = sadd.s32 1, %s812_s14 }
   0x7   : > { %s65_s20 = ssub.s32 %s816_s15, %s872_s18  ;;  %p75_p0 = scmp.ne.s32.totalorder %s812_s14, %s808_s13 }
   0x8   : > { %p66_p1 = scmp.eq.s32.totalorder %s65_s20, 0  ;;  %p76_p2 = scmp.eq.s32.totalorder %s816_s15, 0 }
   0x9   : > { %p81_p3 = scmp.ne.s32.totalorder %s808_s13, %s804_s12  ;;  %p82_p4 = scmp.eq.s32.totalorder %s868_s16, 0 }
   0xa   : > { %s884_s21 = scalar_select %p66_p1, %s812_s14, %s68_s19  }
   0xb   : > { %p886_p5 = por %p76_p2, %p75_p0  ;;  %p890_p6 = por %p82_p4, %p81_p3 }
   0xc   : > { %p105_p7 = scmp.eq.s32.totalorder %s868_s16, 1  ;;  %p111_p8 = scmp.eq.s32.totalorder %s491_s17, 1 }
   0xd   : > { %p672_p10 = scmp.lt.s32.totalorder %s816_s15, 2  ;;  %s137_s26 = sand.u32 1, %s812_s14  }
   0xe   : > { %p897_p11 = por %p105_p7, %p75_p0  ;;  %p901_p12 = por %p111_p8, %p81_p3 }
   0xf   : > { %s507_s27 = sshll.u32 %s816_s15, 11  ;;  %s494_s28 = sshll.u32 %s137_s26, 7 }
  0x10   : > { %s1060_s24 = scalar_select %p897_p11, 1, 0 }
  0x11   : > { %s1061_s25 = scalar_select %p901_p12, 1, 0 }
  0x12   : > { %s910_s4 = scalar_lea.hbm %s1055_s2, %s507_s27  ;;  %s141_s5 = scalar_lea.vmem [#allocation2], %s494_s28 }
  0x13   : > { %s148_s6 = sshll.u32 %s141_s5, 4  ;;  %p914_p13 = pnand %p672_p10, %p886_p5  ;;  %s918_s6 = int_to_ptr.vmem [resolvable:$true] %s148_s6 }
  0x14   : > { %s920_s8 = scalar_lea.sflag [#allocation3], %s137_s26  ;;  %s720_s9 = scalar_lea.hbm %s910_s4, 2048 }
  0x15   : > { %p721_p0 = scmp.ne.s32.totalorder %s910_s4, %s720_s9  ;;  %p722_p1 = pneg %p914_p13 }
  0x16   : > { %s725_s17 = scalar_lea.hbm %s1055_s2, 4096  ;;  %p726_p4 = scmp.lt.u32.totalorder %s910_s4, %s1055_s2 }
  0x17   : > { %p723_p2 = pnand %p722_p1, %p721_p0  ;;  %p727_p5 = scmp.lt.u32.totalorder %s725_s17, %s720_s9 }
  0x18   : > { %p729_p8 = scmp.lt.u32.totalorder %s720_s9, %s910_s4 }
  0x19   : > { %p724_p3 = pneg %p723_p2  ;;  %p728_p7 = por %p727_p5, %p726_p4 }
  0x1b   : > { %p730_p10 = por %p729_p8, %p728_p7 }
  0x1d   : > { %p731_p9 = pnand %p730_p10, %p724_p3 }
  0x1f   : > { %734 = shalt.err (!%p731_p9)
}
  0x20   : > { %s735_s22 = scalar_lea.vmem %s918_s6, 2048  ;;  %s818_s26 = smov [#allocation2]  }
  0x21   : > { %p736_p0 = scmp.ne.s32.totalorder %s918_s6, %s735_s22  ;;  %s740_s27 = sshll.u32 %s818_s26, 4  ;;  %s741_s27 = int_to_ptr.vmem [resolvable:$false] %s740_s27 }
  0x22   : > { %s742_s28 = scalar_lea.vmem %s741_s27, 4096  ;;  %p743_p11 = scmp.lt.s32.totalorder %s918_s6, %s741_s27 }
  0x23   : > { %p738_p2 = pnand %p736_p0, %p722_p1  ;;  %p744_p4 = scmp.lt.s32.totalorder %s742_s28, %s735_s22 }
  0x25   : > { %p739_p12 = pneg %p738_p2  ;;  %p745_p5 = por %p744_p4, %p743_p11 }
  0x27   : > { %p746_p7 = pnand %p745_p5, %p739_p12 }
  0x29   : > { %749 = shalt.err (!%p746_p7)
}
  0x2a   : > { %s819_s29 = smov 128   ;;  %s820_s30 = smov 8  }
  0x2b   : > { %667 = dma.hbm_to_vmem [thread:$0]  (!%p914_p13), %s910_s4, 2048, %s918_s6, %s920_s8, %s819_s29, %s819_s29, %s820_s30  }
  0x2c   : > { %p497_p9 = scmp.ge.s32.totalorder %s816_s15, 1  ;;  %p156_p1 = scmp.lt.s32.totalorder %s816_s15, 3 }
  0x2e   : > { %p157_p3 = pnand %p497_p9, %p156_p1 }
  0x2f   : > { %s951_s5 = sand.u32 (!%p157_p3), 1, %s808_s13  }
  0x30   : > { %160 = sbr.rel (%p157_p3) target bundleno = 399 (0x18f), region = 32  ;;  %s498_s9 = sshll.u32 (!%p157_p3), %s951_s5, 7 }
  0x31   : > { %s163_s10 = scalar_lea.sflag (!%p157_p3), [#allocation3], %s951_s5  ;;  %s955_s11 = scalar_lea.vmem (!%p157_p3), [#allocation2], %s498_s9 }
  0x37   : > { %795 = dma.done.wait (%p890_p6), %s163_s10, 2048  }
  0x38   : > { %797 = vsyncadd (%p890_p6), %s163_s10, 4294965248  ;;  %v821_v0 = vmov 0.0|0.0   ;;  %vm822_vm0 = vmmov 0   ;;  %v823_v1 = vmov 0.0   ;;  %v824_v2 = vmov 0   ;;  %v196_v3 = vld [vmem:[%s955_s11] sm:$0xff] }
  0x39   : > { %612 = vmatprep.subr.bf16.mxu0 %v821_v0  ;;  %636 = vmatprep.subr.bf16.mxu1 %v821_v0  ;;  %v197_v4 = vld [vmem:[%s955_s11 + $0x8] sm:$0xff]  ;;  %v212_v5 = vmul.f32 %v196_v3, %v196_v3  ;;  %v198_v8 = vld [vmem:[%s955_s11 + $0x10] sm:$0xff]  ;;  %v199_v9 = vld [vmem:[%s955_s11 + $0x18] sm:$0xff]  ;;  %v825_v54 = vmov 1.0   ;;  %v371_v62 = vlaneseq  ;;  %s502_s8 = sshll.u32 %s868_s16, 7  ;;  %s499_s17 = sshll.u32 %s951_s5, 3 }
  0x3a   : > { %574 = vmatprep.mubr.msk.f32.mxu0 %vm822_vm0, %v823_v1  ;;  %609 = vmatprep.mubr.msk.f32.mxu1 %vm822_vm0, %v823_v1  ;;  %v213_v6 = vmul.f32 %v197_v4, %v197_v4  ;;  %v637_v7 = vpack.c.bf16 %v197_v4, %v196_v3  ;;  %v214_v11 = vmul.f32 %v198_v8, %v198_v8  ;;  %v972_v14 = vld [vmem:[%s1053_s0] sm:$0xff]  ;;  %v201_v18 = vld [vmem:[%s955_s11 + $0x28] sm:$0xff]  ;;  %v202_v23 = vld [vmem:[%s955_s11 + $0x30] sm:$0xff]  ;;  %s188_s16 = scalar_lea.vmem [#allocation5], %s499_s17  ;;  %s1009_s26 = scalar_lea.hbm %s1056_s3, %s502_s8 }
  0x3b   : > { %713 = vset.pattern.permute.xlu0 %v824_v2  ;;  %v215_v12 = vmul.f32 %v199_v9, %v199_v9  ;;  %v640_v13 = vpack.c.bf16 %v199_v9, %v198_v8  ;;  %v191_v15 = vmul.f32 %v972_v14, %v972_v14  ;;  %v200_v17 = vld [vmem:[%s955_s11 + $0x20] sm:$0xff]  ;;  %v217_v20 = vmul.f32 %v201_v18, %v201_v18  ;;  %v203_v24 = vld [vmem:[%s955_s11 + $0x38] sm:$0xff]  ;;  %v205_v30 = vld [vmem:[%s955_s11 + $0x48] sm:$0xff]  ;;  %s421_s19 = sshll.u32 %s188_s16, 4  ;;  %s408_s27 = scalar_lea.sflag [#allocation4], %s951_s5  ;;  %s1011_s19 = int_to_ptr.vmem [resolvable:$true] %s421_s19 }
  0x3c   : > { %v613_v10 = vpack.c.bf16 %v213_v6, %v212_v5  ;;  %638 = vmatpush3.bf16.xpose.msra.mxu1 %v637_v7  ;;  %v216_v19 = vmul.f32 %v200_v17, %v200_v17  ;;  %v643_v21 = vpack.c.bf16 %v201_v18, %v200_v17  ;;  %v218_v25 = vmul.f32 %v202_v23, %v202_v23  ;;  %v204_v29 = vld [vmem:[%s955_s11 + $0x40] sm:$0xff]  ;;  %v206_v36 = vld [vmem:[%s955_s11 + $0x50] sm:$0xff]  ;;  %v207_v37 = vld [vmem:[%s955_s11 + $0x58] sm:$0xff]  ;;  %s750_s28 = scalar_lea.vmem %s1011_s19, 128  ;;  %p1063_p11 = scmp.ne.s32.totalorder %s1060_s24, 0 }
  0x3d   : > { %639 = vmatprep.subr.bf16.mxu1 %v821_v0  ;;  %v616_v16 = vpack.c.bf16 %v215_v12, %v214_v11  ;;  %192 = vadd.xlane.f32.xlu0 %v191_v15  ;;  %v219_v26 = vmul.f32 %v203_v24, %v203_v24  ;;  %v646_v27 = vpack.c.bf16 %v203_v24, %v202_v23  ;;  %v394_v33 = vld [vmem:[%s1054_s1] sm:$0xff]  ;;  %v209_v43 = vld [vmem:[%s955_s11 + $0x68] sm:$0xff]  ;;  %v210_v48 = vld [vmem:[%s955_s11 + $0x70] sm:$0xff]  ;;  %v372_v63 = vshrl.u32 %v371_v62, 7  ;;  %p751_p6 = scmp.ne.s32.totalorder %s1011_s19, %s750_s28  ;;  %s826_s29 = smov [#allocation5]  }
  0x3e   : > { %614 = vmatpush3.bf16.xpose.msra.mxu0 %v613_v10  ;;  %v619_v22 = vpack.c.bf16 %v217_v20, %v216_v19  ;;  %v220_v31 = vmul.f32 %v204_v29, %v204_v29  ;;  %v221_v32 = vmul.f32 %v205_v30, %v205_v30  ;;  %v649_v34 = vpack.c.bf16 %v205_v30, %v204_v29  ;;  %v208_v42 = vld [vmem:[%s955_s11 + $0x60] sm:$0xff]  ;;  %v211_v49 = vld [vmem:[%s955_s11 + $0x78] sm:$0xff]  ;;  %s754_s30 = sshll.u32 %s826_s29, 4  ;;  %s755_s30 = int_to_ptr.vmem [resolvable:$false] %s754_s30 }
  0x3f   : > { %615 = vmatprep.subr.bf16.mxu0 %v821_v0  ;;  %v622_v28 = vpack.c.bf16 %v219_v26, %v218_v25  ;;  %v222_v38 = vmul.f32 %v206_v36, %v206_v36  ;;  %v223_v39 = vmul.f32 %v207_v37, %v207_v37  ;;  %v652_v40 = vpack.c.bf16 %v207_v37, %v206_v36  ;;  %p752_p12 = pnand %p751_p6, %p1063_p11  ;;  %s756_s9 = scalar_lea.vmem %s755_s30, 256 }
  0x40   : > { %v625_v35 = vpack.c.bf16 %v221_v32, %v220_v31  ;;  %v224_v44 = vmul.f32 %v208_v42, %v208_v42  ;;  %v225_v45 = vmul.f32 %v209_v43, %v209_v43  ;;  %v655_v46 = vpack.c.bf16 %v209_v43, %v208_v42  ;;  %p757_p8 = scmp.lt.s32.totalorder %s1011_s19, %s755_s30  ;;  %p758_p10 = scmp.lt.s32.totalorder %s756_s9, %s750_s28 }
  0x41   : > { %v628_v41 = vpack.c.bf16 %v223_v39, %v222_v38  ;;  %v226_v50 = vmul.f32 %v210_v48, %v210_v48  ;;  %v227_v51 = vmul.f32 %v211_v49, %v211_v49  ;;  %v658_v52 = vpack.c.bf16 %v211_v49, %v210_v48  ;;  %p753_p13 = pneg %p752_p12 }
  0x42   : > { %v631_v47 = vpack.c.bf16 %v225_v45, %v224_v44  ;;  %v373_v1 = vsub.s32 0, %v372_v63  ;;  %v397_v10 = vand.u32 127, %v371_v62  ;;  %v398_v12 = vstv %s502_s8  ;;  %p759_p0 = por %p758_p10, %p757_p8 }
  0x43   : > { %v634_v53 = vpack.c.bf16 %v227_v51, %v226_v50 }
  0x44   : > { %641 = vmatpush3.bf16.xpose.msra.mxu1 %v640_v13  ;;  %p760_p2 = pnand %p759_p0, %p753_p13 }
  0x45   : > { %642 = vmatprep.subr.bf16.mxu1 %v821_v0 }
  0x46   : > { %617 = vmatpush3.bf16.xpose.msra.mxu0 %v616_v16  ;;  %v399_v16 = vadd.s32 %v398_v12, %v397_v10 }
  0x47   : > { %618 = vmatprep.subr.bf16.mxu0 %v821_v0 }
  0x4c   : > { %644 = vmatpush3.bf16.xpose.msra.mxu1 %v643_v21 }
  0x4d   : > { %645 = vmatprep.subr.bf16.mxu1 %v821_v0 }
  0x4e   : > { %620 = vmatpush3.bf16.xpose.msra.mxu0 %v619_v22 }
  0x4f   : > { %621 = vmatprep.subr.bf16.mxu0 %v821_v0 }
  0x53   : > { %401 = vperm.xlu0 %713, %v394_v33  }
  0x54   : > { %647 = vmatpush3.bf16.xpose.msra.mxu1 %v646_v27 }
  0x55   : > { %648 = vmatprep.subr.bf16.mxu1 %v821_v0 }
  0x56   : > { %623 = vmatpush3.bf16.xpose.msra.mxu0 %v622_v28 }
  0x57   : > { %624 = vmatprep.subr.bf16.mxu0 %v821_v0 }
  0x5c   : > { %650 = vmatpush3.bf16.xpose.msra.mxu1 %v649_v34 }
  0x5d   : > { %651 = vmatprep.subr.bf16.mxu1 %v821_v0 }
  0x5e   : > { %626 = vmatpush3.bf16.xpose.msra.mxu0 %v625_v35 }
  0x5f   : > { %627 = vmatprep.subr.bf16.mxu0 %v821_v0 }
  0x64   : > { %653 = vmatpush3.bf16.xpose.msra.mxu1 %v652_v40 }
  0x65   : > { %654 = vmatprep.subr.bf16.mxu1 %v821_v0 }
  0x66   : > { %629 = vmatpush3.bf16.xpose.msra.mxu0 %v628_v41 }
  0x67   : > { %630 = vmatprep.subr.bf16.mxu0 %v821_v0 }
  0x6c   : > { %656 = vmatpush3.bf16.xpose.msra.mxu1 %v655_v46 }
  0x6d   : > { %657 = vmatprep.subr.bf16.mxu1 %v821_v0 }
  0x6e   : > { %632 = vmatpush3.bf16.xpose.msra.mxu0 %v631_v47 }
  0x6f   : > { %633 = vmatprep.subr.bf16.mxu0 %v821_v0 }
  0x74   : > { %659 = vmatpush3.bf16.xpose.msra.mxu1 %v658_v52 }
  0x76   : > { %635 = vmatpush3.bf16.xpose.msra.mxu0 %v634_v53 }
  0x7b   : > { %610 = vmatmul.mubr.f32.vlgmr.msra.gmra.mrb[0].mxu1 %v972_v14 }
  0x7d   : > { %575 = vmatmul.mubr.f32.vlgmr.msra.gmra.mrb[0].mxu0 %v825_v54 }
  0xca   : > { %v193_v55 = vpop.xlane.xlu0 %192 }
  0xcb   : > { %v194_v56 = vmax.f32 %v193_v55, 1e-24 }
  0xcd   : > { %714 = vrsqrt.f32 %v194_v56 }
  0xd2   : > { %v402_v19 = vpop.permute.xlu0 %401 }
  0xd3   : > { %vm403_vm3 = vcmp.eq.s32.totalorder %v399_v16, %v402_v19 }
  0xd7   : > { %v715_v0 = vpop.eup %714 }
 0x14e   : > { %v366_v57 = vpop.f32.mrb[0].mxu1 }
 0x14f   : > { %v611_v58 = vpop.f32.mrb[1].mxu1  ;;  %v370_v2 = vmul.f32 %v715_v0, %v366_v57 }
 0x150   : > { %v294_v59 = vpop.f32.mrb[0].mxu0 }
 0x151   : > { %v298_v60 = vmax.f32 %v294_v59, 1e-24  ;;  %v576_v61 = vpop.f32.mrb[1].mxu0 }
 0x153   : > { %716 = vrsqrt.f32 %v298_v60 }
 0x15d   : > { %v717_v3 = vpop.eup %716 }
 0x15e   : > { %v374_v4 = vrot.slane %v717_v3, %v373_v1 }
 0x160   : > { %v375_v5 = vmul.f32 %v374_v4, %v370_v2 }
 0x162   : > { %v376_v6 = vmul.f32 %v375_v5, %v375_v5  ;;  %v500_v18 = vadd.f32 0.87758255, %v375_v5  ;;  %v387_v20 = vmul.f32 0.87758255, %v375_v5  ;;  %v501_v23 = vadd.f32 -0.23971277, %v375_v5 }
 0x164   : > { %v377_v7 = vsub.f32 1.0, %v376_v6  ;;  %vm391_vm4 = vcmp.gt.f32.partialorder %v500_v18, 0.0 }
 0x166   : > { %v378_v8 = vmax.f32 %v377_v7, 0.0 }
 0x168   : > { %v379_v9 = vmin.f32 %v378_v8, 1.0 }
 0x16a   : > { %718 = vrsqrt.f32 %v379_v9  ;;  %vm382_vm1 = vcmp.eq.f32.partialorder %v379_v9, inf  ;;  %v385_v14 = vand.u32 2147483648, %v379_v9  ;;  %vm384_vm2 = vcmp.eq.f32.partialorder %v379_v9, 0.0 }
 0x174   : > { %v719_v11 = vpop.eup %718 }
 0x175   : > { %v381_v13 = vmul.f32 %v719_v11, %v379_v9 }
 0x177   : > { %v383_v15 = vsel %vm382_vm1, %v379_v9, %v381_v13 }
 0x178   : > { %v386_v17 = vsel %vm384_vm2, %v385_v14, %v383_v15 }
 0x179   : > { %v388_v21 = vmul.f32 0.47942555, %v386_v17 }
 0x17b   : > { %v389_v22 = vsub.f32 %v387_v20, %v388_v21 }
 0x17d   : > { %v393_v24 = vsel %vm391_vm4, %v389_v22, %v501_v23 }
 0x17e   : > { %v404_v25 = vsel %vm403_vm3, %v393_v24, %v375_v5 }
 0x17f   : > { %v405_v26 = vmul.f32 32.0, %v404_v25 }
 0x181   : > { %406 = vst [vmem:[%s188_s16] sm:$0xff] %v405_v26 }
 0x182   : > { %763 = shalt.err (!%p760_p2)
}
 0x183   : > { %s764_s5 = scalar_lea.hbm %s1009_s26, 128  ;;  %s768_s23 = scalar_lea.hbm %s1056_s3, 256 }
 0x184   : > { %p765_p4 = scmp.ne.s32.totalorder %s1009_s26, %s764_s5  ;;  %p769_p9 = scmp.lt.u32.totalorder %s1009_s26, %s1056_s3 }
 0x185   : > { %p770_p1 = scmp.lt.u32.totalorder %s768_s23, %s764_s5  ;;  %p772_p6 = scmp.lt.u32.totalorder %s764_s5, %s1009_s26 }
 0x186   : > { %p766_p5 = pnand %p765_p4, %p1063_p11 }
 0x187   : > { %p771_p3 = por %p770_p1, %p769_p9 }
 0x188   : > { %p767_p7 = pneg %p766_p5 }
 0x189   : > { %p773_p12 = por %p772_p6, %p771_p3 }
 0x18b   : > { %p774_p13 = pnand %p773_p12, %p767_p7 }
 0x18d   : > { %777 = shalt.err (!%p774_p13)
}
 0x18e   : > { %662 = dma.vmem_to_hbm [thread:$0]  (%p1063_p11), %s1011_s19, 128, %s1009_s26, %s408_s27  }
 0x18f PF: > { %s433_s7 = sand.u32 1, %s804_s12   ;;  %p1064_p8 = scmp.ne.s32.totalorder %s1061_s25, 0 }
 0x190   : > { %p1065_p10 = scmp.ge.s32.totalorder %s816_s15, 2  ;;  %s434_s8 = scalar_lea.sflag [#allocation4], %s433_s7 }
 0x192   : > { %p669_p0 = pnand %p1065_p10, %p1064_p8 }
 0x194   : > { %799 = dma.done.wait (!%p669_p0), %s434_s8, 128  }
 0x195   : > { %801 = vsyncadd (!%p669_p0), %s434_s8, 4294967168  ;;  %p16_p2 = scmp.ge.s32.totalorder %s872_s18, 4   ;;  %s1066_s12 = smov %s808_s13 }
 0x196   : > { %s1067_s13 = smov %s812_s14  ;;  %s1068_s14 = smov %s884_s21 }
 0x197   : > { %s1069_s15 = smov %s872_s18  ;;  %18 = sbr.rel (!%p16_p2) target bundleno = 5 (0x5), region = 77 }
 0x19e   :  { %439 = vsyncpa [#allocation3], 1 }
 0x19f   :  { %441 = vsyncpa [#allocation3 + $0x1], 1 }
 0x1a0   :  { %442 = vsyncpa [#allocation4], 1 }
 0x1a1   :  { %444 = vsyncpa [#allocation4 + $0x1], 1 }

</bundles_post_ra>
